<compile_context>
chip_gen: v7x
topology: tpu7x:2x2x1
jax: 0.10.0
libtpu: 0.0.40
codegen_flags: <defaults>
</compile_context>

<pallas_src>
import jax
import jax.numpy as jnp
import numpy as np
from jax.experimental import pallas as pl
from jax.experimental.pallas import tpu as pltpu

# Fixed 9x9 kernel from the PyTorch module (compile-time constant).
KERNEL_9x9 = [
    [0, 0, 0.00015924, 0.00047771, 0.00079618, 0.00047771, 0.00015924, 0, 0],
    [0, 0.00031847, 0.00286624, 0.00971338, 0.01417197, 0.00971338, 0.00286624, 0.00031847, 0],
    [0.00015924, 0.00286624, 0.02038217, 0.0522293, 0.06464968, 0.0522293, 0.02038217, 0.00286624, 0.00015924],
    [0.00047771, 0.00971338, 0.0522293, 0.05859873, 0, 0.05859873, 0.0522293, 0.00971338, 0.00047771],
    [0.00079618, 0.01417197, 0.06464968, 0, -0.15923567, 0, 0.06464968, 0.01417197, 0.00079618],
    [0.00047771, 0.00971338, 0.0522293, 0.05859873, 0, 0.05859873, 0.0522293, 0.00971338, 0.00047771],
    [0.00015924, 0.00286624, 0.02038217, 0.0522293, 0.06464968, 0.0522293, 0.02038217, 0.00286624, 0.00015924],
    [0, 0.00031847, 0.00286624, 0.00971338, 0.01417197, 0.00971338, 0.00286624, 0.00031847, 0],
    [0, 0, 0.00015924, 0.00047771, 0.00079618, 0.00047771, 0.00015924, 0, 0],
]

KH, KW = 9, 9
PAD = 4
LANES = 128

# Static guards for the padding / symmetry tricks used below.
assert KH == 2 * PAD + 1 and KW == 2 * PAD + 1, "padding math assumes 9x9 kernel with pad=4"
for _r in range(KH):
    for _c in range(KW):
        assert KERNEL_9x9[_r][_c] == KERNEL_9x9[_r][KW - 1 - _c], "kernel must be left-right symmetric"


def _round_up(v, m):
    return (v + m - 1) // m * m


def _tree_sum(xs):
    """Balanced pairwise reduction (shorter dependency chain than a serial fold)."""
    xs = list(xs)
    while len(xs) > 1:
        nxt = [xs[i] + xs[i + 1] for i in range(0, len(xs) - 1, 2)]
        if len(xs) % 2:
            nxt.append(xs[-1])
        xs = nxt
    return xs[0]


def _column_groups(k9):
    """For each of the 5 distinct kernel columns: ((weight, (ky, ...)), ...) over nonzero taps."""
    cols = []
    for c in range(KW // 2 + 1):
        groups = {}
        for ky in range(KH):
            w = float(k9[ky][c])
            if w != 0.0:
                groups.setdefault(w, []).append(ky)
        cols.append(tuple((w, tuple(kys)) for w, kys in groups.items()))
    return tuple(cols)


COLUMN_GROUPS = _column_groups(KERNEL_9x9)


def kernel_d(w1, w2, k9):
    """Replicates torch kernel_d: weight of shape (w2, w1, 9, 9) = (OC, IC, KH, KW)."""
    k = jnp.asarray(k9, dtype=jnp.float32)
    return jnp.tile(k[None, None], (w2, w1, 1, 1))


def make_conv_kernel(C, OC, H, W, img_row0):
    def conv_kernel(x_ref, b_ref, o_ref, frame_ref):
        # x_ref:     VMEM (C, H, W)        one image (batch dim squeezed)
        # b_ref:     SMEM (OC,)            per-output-channel bias scalars
        # o_ref:     VMEM (OC, H, LANES)   lane-dense output (cols >= W are garbage)
        # frame_ref: VMEM (rows, LANES)    zero-padded channel-sum frame

        # 1) channel sum (valid because every (oc, ic) weight plane is identical).
        x_sum = _tree_sum([x_ref[c].astype(jnp.float32) for c in range(C)])      # (H, W)

        # 2) build the vertically padded, lane-zero-padded frame in VMEM
        #    (image rows start at a vreg-aligned sublane offset).
        frame_ref[...] = jnp.zeros_like(frame_ref)
        frame_ref[img_row0:img_row0 + H, 0:W] = x_sum

        # 3) nine row-shifted slabs: pure sublane-offset VMEM loads (cheap vld).
        row0 = img_row0 - PAD
        S = [frame_ref[row0 + ky:row0 + ky + H, :] for ky in range(KH)]          # (H, LANES)

        # 4) per-kernel-column weighted sums. Vertical symmetry folded by grouping
        #    equal weights (one multiply per unique weight); columns kx and
        #    KW-1-kx are identical so only 5 distinct columns are computed.
        G = []
        for groups in COLUMN_GROUPS:
            terms = [_tree_sum([S[ky] for ky in kys]) * wval for wval, kys in groups]
            G.append(_tree_sum(terms))

        # 5) combine the 9 columns with one lane-roll each (8 nonzero shifts).
        #    Wrap safety: frame lanes >= W are zero and wrapped lanes land beyond
        #    the W output columns that are kept by the wrapper.
        parts = []
        for kx in range(KW):
            g = G[min(kx, KW - 1 - kx)]
            shift = (PAD - kx) % LANES
            if shift:
                g = pltpu.roll(g, shift=shift, axis=1)
            parts.append(g)
        conv = _tree_sum(parts)                                                   # (H, LANES)

        # 6) bias + ReLU per output channel; conv sum is shared across oc
        #    (replicated weights), only the bias differs.  Full (H, 128) stores.
        for oc in range(OC):
            o_ref[oc] = jnp.maximum(conv + b_ref[oc], 0.0)

    return conv_kernel


def new_conv_forward(x, bias):
    """relu(conv2d(x, kernel_d(C, OC, KERNEL_9x9), bias, padding=4)) in NCHW.

    NOTE: relies on the module's replicated fixed 9x9 weight (kernel_d). If the
    weights become distinct / trainable, revert to a general per-(oc, ic) conv.
    """
    N, C, H, W = x.shape
    OC = bias.shape[0]

    assert W + PAD <= LANES, "wide images need a multi-tile lane layout"
    # TODO(synk): for large H/W, row-tile H with an 8-row halo (and lane-tile W)
    # to respect v7x's 64 MiB VMEM; unnecessary at these shapes.

    img_row0 = _round_up(PAD, 8)                       # image rows start vreg-aligned
    frame_rows = _round_up(img_row0 + H + PAD, 8)

    # Crude VMEM budget check: double-buffered in/out blocks + scratch frame.
    blk_bytes = (2 * C * _round_up(H, 8) * LANES * 4
                 + 2 * OC * _round_up(H, 8) * LANES * 4
                 + frame_rows * LANES * 4)
    assert blk_bytes < 24 * 1024 * 1024, "image too large for single-block kernel; row-tile H"

    conv_kernel = make_conv_kernel(C, OC, H, W, img_row0)

    out_padded = pl.pallas_call(
        conv_kernel,
        out_shape=jax.ShapeDtypeStruct((N, OC, H, LANES), jnp.float32),
        grid=(N,),
        in_specs=[
            pl.BlockSpec((None, C, H, W), lambda n: (n, 0, 0, 0)),      # one raw image / step
            pl.BlockSpec(memory_space=pltpu.MemorySpace.SMEM),          # bias scalars
        ],
        out_specs=pl.BlockSpec((None, OC, H, LANES), lambda n: (n, 0, 0, 0)),
        scratch_shapes=[pltpu.VMEM((frame_rows, LANES), jnp.float32)],
        compiler_params=pltpu.CompilerParams(
            dimension_semantics=("parallel",)),        # images shard across TCs on v7x
    )(x, bias.astype(jnp.float32))

    # Drop the LANES - W garbage columns of the lane-dense output.
    return out_padded[:, :, :, :W]


def reference_forward(x, weight, bias):
    out = jax.lax.conv_general_dilated(
        x, weight, window_strides=(1, 1),
        padding=((PAD, PAD), (PAD, PAD)),
        dimension_numbers=("NCHW", "OIHW", "NCHW"))
    out = out + bias[None, :, None, None]
    return jnp.maximum(out, 0.0)


if __name__ == "__main__":
    # new_conv(w_1=in_ch, w_2=out_ch, w_3, w_4, b=out_ch, kernel)
    N, C, OC, H, W = 2, 4, 4, 16, 16

    key = jax.random.PRNGKey(0)
    k_x, k_b = jax.random.split(key)
    x = jax.random.normal(k_x, (N, C, H, W), dtype=jnp.float32)
    bias = jax.random.normal(k_b, (OC,), dtype=jnp.float32)     # torch.randn(b) analogue

    out = jax.block_until_ready(new_conv_forward(x, bias))

    weight = kernel_d(C, OC, KERNEL_9x9)                        # (OC, C, 9, 9) fixed values
    ref = reference_forward(x, weight, bias)
    np.testing.assert_allclose(np.asarray(out), np.asarray(ref), atol=1e-4, rtol=1e-4)

    print("KERNEL_OK")
</pallas_src>

<mosaic_0001>
module attributes {stable_mosaic.version = 11 : i64} {
  func.func @conv_kernel(%arg0: i32, %arg1: memref<1x4x16x16xf32, #tpu.memory_space<vmem>>, %arg2: memref<4xf32, #tpu.memory_space<smem>>, %arg3: memref<1x4x16x128xf32, #tpu.memory_space<vmem>>, %arg4: memref<32x128xf32, #tpu.memory_space<vmem>>) attributes {dimension_semantics = [#tpu.dimension_semantics<parallel>], iteration_bounds = array<i64: 2>, scalar_prefetch = 0 : i64, scratch_operands = 1 : i64, tpu.core_type = #tpu.core_type<tc>, window_params = [{transform_indices = @transform_0, window_bounds = array<i64: 1, 4, 16, 16>}, {transform_indices = @transform_1, window_bounds = array<i64: 4>}, {transform_indices = @transform_2, window_bounds = array<i64: 1, 4, 16, 128>}]} {
    %c0 = arith.constant 0 : index
    %c0_0 = arith.constant 0 : index
    %c0_1 = arith.constant 0 : index
    %c0_2 = arith.constant 0 : index
    %0 = vector.load %arg1[%c0, %c0_0, %c0_1, %c0_2] : memref<1x4x16x16xf32, #tpu.memory_space<vmem>>, vector<1x1x16x16xf32>
    %1 = vector.shape_cast %0 : vector<1x1x16x16xf32> to vector<16x16xf32>
    %c0_3 = arith.constant 0 : index
    %c1 = arith.constant 1 : index
    %c0_4 = arith.constant 0 : index
    %c0_5 = arith.constant 0 : index
    %2 = vector.load %arg1[%c0_3, %c1, %c0_4, %c0_5] : memref<1x4x16x16xf32, #tpu.memory_space<vmem>>, vector<1x1x16x16xf32>
    %3 = vector.shape_cast %2 : vector<1x1x16x16xf32> to vector<16x16xf32>
    %c0_6 = arith.constant 0 : index
    %c2 = arith.constant 2 : index
    %c0_7 = arith.constant 0 : index
    %c0_8 = arith.constant 0 : index
    %4 = vector.load %arg1[%c0_6, %c2, %c0_7, %c0_8] : memref<1x4x16x16xf32, #tpu.memory_space<vmem>>, vector<1x1x16x16xf32>
    %5 = vector.shape_cast %4 : vector<1x1x16x16xf32> to vector<16x16xf32>
    %c0_9 = arith.constant 0 : index
    %c3 = arith.constant 3 : index
    %c0_10 = arith.constant 0 : index
    %c0_11 = arith.constant 0 : index
    %6 = vector.load %arg1[%c0_9, %c3, %c0_10, %c0_11] : memref<1x4x16x16xf32, #tpu.memory_space<vmem>>, vector<1x1x16x16xf32>
    %7 = vector.shape_cast %6 : vector<1x1x16x16xf32> to vector<16x16xf32>
    %8 = arith.addf %1, %3 : vector<16x16xf32>
    %9 = arith.addf %5, %7 : vector<16x16xf32>
    %10 = arith.addf %8, %9 : vector<16x16xf32>
    %cst = arith.constant 0.000000e+00 : f32
    %11 = vector.broadcast %cst : f32 to vector<32x128xf32>
    %c0_12 = arith.constant 0 : index
    %c0_13 = arith.constant 0 : index
    %12 = vector.load %arg4[%c0_12, %c0_13] : memref<32x128xf32, #tpu.memory_space<vmem>>, vector<32x128xf32>
    tpu.vector_store %arg4[%c0_12, %c0_13], %11 {strides = array<i32>} : memref<32x128xf32, #tpu.memory_space<vmem>>, vector<32x128xf32>,
    %c8 = arith.constant 8 : index
    %c0_14 = arith.constant 0 : index
    %13 = vector.load %arg4[%c8, %c0_14] : memref<32x128xf32, #tpu.memory_space<vmem>>, vector<16x16xf32>
    tpu.vector_store %arg4[%c8, %c0_14], %10 {strides = array<i32>} : memref<32x128xf32, #tpu.memory_space<vmem>>, vector<16x16xf32>,
    %c4 = arith.constant 4 : index
    %c0_15 = arith.constant 0 : index
    %14 = vector.load %arg4[%c4, %c0_15] : memref<32x128xf32, #tpu.memory_space<vmem>>, vector<16x128xf32>
    %c5 = arith.constant 5 : index
    %c0_16 = arith.constant 0 : index
    %15 = vector.load %arg4[%c5, %c0_16] : memref<32x128xf32, #tpu.memory_space<vmem>>, vector<16x128xf32>
    %c6 = arith.constant 6 : index
    %c0_17 = arith.constant 0 : index
    %16 = vector.load %arg4[%c6, %c0_17] : memref<32x128xf32, #tpu.memory_space<vmem>>, vector<16x128xf32>
    %c7 = arith.constant 7 : index
    %c0_18 = arith.constant 0 : index
    %17 = vector.load %arg4[%c7, %c0_18] : memref<32x128xf32, #tpu.memory_space<vmem>>, vector<16x128xf32>
    %c8_19 = arith.constant 8 : index
    %c0_20 = arith.constant 0 : index
    %18 = vector.load %arg4[%c8_19, %c0_20] : memref<32x128xf32, #tpu.memory_space<vmem>>, vector<16x128xf32>
    %c9 = arith.constant 9 : index
    %c0_21 = arith.constant 0 : index
    %19 = vector.load %arg4[%c9, %c0_21] : memref<32x128xf32, #tpu.memory_space<vmem>>, vector<16x128xf32>
    %c10 = arith.constant 10 : index
    %c0_22 = arith.constant 0 : index
    %20 = vector.load %arg4[%c10, %c0_22] : memref<32x128xf32, #tpu.memory_space<vmem>>, vector<16x128xf32>
    %c11 = arith.constant 11 : index
    %c0_23 = arith.constant 0 : index
    %21 = vector.load %arg4[%c11, %c0_23] : memref<32x128xf32, #tpu.memory_space<vmem>>, vector<16x128xf32>
    %c12 = arith.constant 12 : index
    %c0_24 = arith.constant 0 : index
    %22 = vector.load %arg4[%c12, %c0_24] : memref<32x128xf32, #tpu.memory_space<vmem>>, vector<16x128xf32>
    %23 = arith.addf %16, %20 : vector<16x128xf32>
    %cst_25 = arith.constant 1.592400e-04 : f32
    %24 = vector.broadcast %cst_25 : f32 to vector<16x128xf32>
    %25 = arith.mulf %23, %24 : vector<16x128xf32>
    %26 = arith.addf %17, %19 : vector<16x128xf32>
    %cst_26 = arith.constant 4.777100e-04 : f32
    %27 = vector.broadcast %cst_26 : f32 to vector<16x128xf32>
    %28 = arith.mulf %26, %27 : vector<16x128xf32>
    %cst_27 = arith.constant 7.96179985E-4 : f32
    %29 = vector.broadcast %cst_27 : f32 to vector<16x128xf32>
    %30 = arith.mulf %18, %29 : vector<16x128xf32>
    %31 = arith.addf %25, %28 : vector<16x128xf32>
    %32 = arith.addf %31, %30 : vector<16x128xf32>
    %33 = arith.addf %15, %21 : vector<16x128xf32>
    %cst_28 = arith.constant 3.184700e-04 : f32
    %34 = vector.broadcast %cst_28 : f32 to vector<16x128xf32>
    %35 = arith.mulf %33, %34 : vector<16x128xf32>
    %36 = arith.addf %16, %20 : vector<16x128xf32>
    %cst_29 = arith.constant 2.866240e-03 : f32
    %37 = vector.broadcast %cst_29 : f32 to vector<16x128xf32>
    %38 = arith.mulf %36, %37 : vector<16x128xf32>
    %39 = arith.addf %17, %19 : vector<16x128xf32>
    %cst_30 = arith.constant 0.00971337966 : f32
    %40 = vector.broadcast %cst_30 : f32 to vector<16x128xf32>
    %41 = arith.mulf %39, %40 : vector<16x128xf32>
    %cst_31 = arith.constant 0.0141719701 : f32
    %42 = vector.broadcast %cst_31 : f32 to vector<16x128xf32>
    %43 = arith.mulf %18, %42 : vector<16x128xf32>
    %44 = arith.addf %35, %38 : vector<16x128xf32>
    %45 = arith.addf %41, %43 : vector<16x128xf32>
    %46 = arith.addf %44, %45 : vector<16x128xf32>
    %47 = arith.addf %14, %22 : vector<16x128xf32>
    %cst_32 = arith.constant 1.592400e-04 : f32
    %48 = vector.broadcast %cst_32 : f32 to vector<16x128xf32>
    %49 = arith.mulf %47, %48 : vector<16x128xf32>
    %50 = arith.addf %15, %21 : vector<16x128xf32>
    %cst_33 = arith.constant 2.866240e-03 : f32
    %51 = vector.broadcast %cst_33 : f32 to vector<16x128xf32>
    %52 = arith.mulf %50, %51 : vector<16x128xf32>
    %53 = arith.addf %16, %20 : vector<16x128xf32>
    %cst_34 = arith.constant 0.0203821696 : f32
    %54 = vector.broadcast %cst_34 : f32 to vector<16x128xf32>
    %55 = arith.mulf %53, %54 : vector<16x128xf32>
    %56 = arith.addf %17, %19 : vector<16x128xf32>
    %cst_35 = arith.constant 5.222930e-02 : f32
    %57 = vector.broadcast %cst_35 : f32 to vector<16x128xf32>
    %58 = arith.mulf %56, %57 : vector<16x128xf32>
    %cst_36 = arith.constant 0.0646496788 : f32
    %59 = vector.broadcast %cst_36 : f32 to vector<16x128xf32>
    %60 = arith.mulf %18, %59 : vector<16x128xf32>
    %61 = arith.addf %49, %52 : vector<16x128xf32>
    %62 = arith.addf %55, %58 : vector<16x128xf32>
    %63 = arith.addf %61, %62 : vector<16x128xf32>
    %64 = arith.addf %63, %60 : vector<16x128xf32>
    %65 = arith.addf %14, %22 : vector<16x128xf32>
    %cst_37 = arith.constant 4.777100e-04 : f32
    %66 = vector.broadcast %cst_37 : f32 to vector<16x128xf32>
    %67 = arith.mulf %65, %66 : vector<16x128xf32>
    %68 = arith.addf %15, %21 : vector<16x128xf32>
    %cst_38 = arith.constant 0.00971337966 : f32
    %69 = vector.broadcast %cst_38 : f32 to vector<16x128xf32>
    %70 = arith.mulf %68, %69 : vector<16x128xf32>
    %71 = arith.addf %16, %20 : vector<16x128xf32>
    %cst_39 = arith.constant 5.222930e-02 : f32
    %72 = vector.broadcast %cst_39 : f32 to vector<16x128xf32>
    %73 = arith.mulf %71, %72 : vector<16x128xf32>
    %74 = arith.addf %17, %19 : vector<16x128xf32>
    %cst_40 = arith.constant 0.0585987307 : f32
    %75 = vector.broadcast %cst_40 : f32 to vector<16x128xf32>
    %76 = arith.mulf %74, %75 : vector<16x128xf32>
    %77 = arith.addf %67, %70 : vector<16x128xf32>
    %78 = arith.addf %73, %76 : vector<16x128xf32>
    %79 = arith.addf %77, %78 : vector<16x128xf32>
    %80 = arith.addf %14, %22 : vector<16x128xf32>
    %cst_41 = arith.constant 7.96179985E-4 : f32
    %81 = vector.broadcast %cst_41 : f32 to vector<16x128xf32>
    %82 = arith.mulf %80, %81 : vector<16x128xf32>
    %83 = arith.addf %15, %21 : vector<16x128xf32>
    %cst_42 = arith.constant 0.0141719701 : f32
    %84 = vector.broadcast %cst_42 : f32 to vector<16x128xf32>
    %85 = arith.mulf %83, %84 : vector<16x128xf32>
    %86 = arith.addf %16, %20 : vector<16x128xf32>
    %cst_43 = arith.constant 0.0646496788 : f32
    %87 = vector.broadcast %cst_43 : f32 to vector<16x128xf32>
    %88 = arith.mulf %86, %87 : vector<16x128xf32>
    %cst_44 = arith.constant -0.159235671 : f32
    %89 = vector.broadcast %cst_44 : f32 to vector<16x128xf32>
    %90 = arith.mulf %18, %89 : vector<16x128xf32>
    %91 = arith.addf %82, %85 : vector<16x128xf32>
    %92 = arith.addf %88, %90 : vector<16x128xf32>
    %93 = arith.addf %91, %92 : vector<16x128xf32>
    %c4_i32 = arith.constant 4 : i32
    %94 = tpu.dynamic_rotate %32 by %c4_i32 dim 1 : vector<16x128xf32>, i32 -> vector<16x128xf32>
    %c3_i32 = arith.constant 3 : i32
    %95 = tpu.dynamic_rotate %46 by %c3_i32 dim 1 : vector<16x128xf32>, i32 -> vector<16x128xf32>
    %c2_i32 = arith.constant 2 : i32
    %96 = tpu.dynamic_rotate %64 by %c2_i32 dim 1 : vector<16x128xf32>, i32 -> vector<16x128xf32>
    %c1_i32 = arith.constant 1 : i32
    %97 = tpu.dynamic_rotate %79 by %c1_i32 dim 1 : vector<16x128xf32>, i32 -> vector<16x128xf32>
    %c127_i32 = arith.constant 127 : i32
    %98 = tpu.dynamic_rotate %79 by %c127_i32 dim 1 : vector<16x128xf32>, i32 -> vector<16x128xf32>
    %c126_i32 = arith.constant 126 : i32
    %99 = tpu.dynamic_rotate %64 by %c126_i32 dim 1 : vector<16x128xf32>, i32 -> vector<16x128xf32>
    %c125_i32 = arith.constant 125 : i32
    %100 = tpu.dynamic_rotate %46 by %c125_i32 dim 1 : vector<16x128xf32>, i32 -> vector<16x128xf32>
    %c124_i32 = arith.constant 124 : i32
    %101 = tpu.dynamic_rotate %32 by %c124_i32 dim 1 : vector<16x128xf32>, i32 -> vector<16x128xf32>
    %102 = arith.addf %94, %95 : vector<16x128xf32>
    %103 = arith.addf %96, %97 : vector<16x128xf32>
    %104 = arith.addf %93, %98 : vector<16x128xf32>
    %105 = arith.addf %99, %100 : vector<16x128xf32>
    %106 = arith.addf %102, %103 : vector<16x128xf32>
    %107 = arith.addf %104, %105 : vector<16x128xf32>
    %108 = arith.addf %106, %107 : vector<16x128xf32>
    %109 = arith.addf %108, %101 : vector<16x128xf32>
    %c0_45 = arith.constant 0 : index
    %110 = memref.load %arg2[%c0_45] : memref<4xf32, #tpu.memory_space<smem>>
    %111 = vector.broadcast %110 : f32 to vector<16x128xf32>
    %112 = arith.addf %109, %111 : vector<16x128xf32>
    %cst_46 = arith.constant 0.000000e+00 : f32
    %113 = vector.broadcast %cst_46 : f32 to vector<16x128xf32>
    %114 = arith.maximumf %112, %113 : vector<16x128xf32>
    %c0_47 = arith.constant 0 : index
    %c0_48 = arith.constant 0 : index
    %c0_49 = arith.constant 0 : index
    %c0_50 = arith.constant 0 : index
    %115 = vector.load %arg3[%c0_47, %c0_48, %c0_49, %c0_50] : memref<1x4x16x128xf32, #tpu.memory_space<vmem>>, vector<1x1x16x128xf32>
    %116 = vector.shape_cast %115 : vector<1x1x16x128xf32> to vector<16x128xf32>
    %117 = vector.shape_cast %114 : vector<16x128xf32> to vector<1x1x16x128xf32>
    tpu.vector_store %arg3[%c0_47, %c0_48, %c0_49, %c0_50], %117 {strides = array<i32>} : memref<1x4x16x128xf32, #tpu.memory_space<vmem>>, vector<1x1x16x128xf32>,
    %c1_51 = arith.constant 1 : index
    %118 = memref.load %arg2[%c1_51] : memref<4xf32, #tpu.memory_space<smem>>
    %119 = vector.broadcast %118 : f32 to vector<16x128xf32>
    %120 = arith.addf %109, %119 : vector<16x128xf32>
    %cst_52 = arith.constant 0.000000e+00 : f32
    %121 = vector.broadcast %cst_52 : f32 to vector<16x128xf32>
    %122 = arith.maximumf %120, %121 : vector<16x128xf32>
    %c0_53 = arith.constant 0 : index
    %c1_54 = arith.constant 1 : index
    %c0_55 = arith.constant 0 : index
    %c0_56 = arith.constant 0 : index
    %123 = vector.load %arg3[%c0_53, %c1_54, %c0_55, %c0_56] : memref<1x4x16x128xf32, #tpu.memory_space<vmem>>, vector<1x1x16x128xf32>
    %124 = vector.shape_cast %123 : vector<1x1x16x128xf32> to vector<16x128xf32>
    %125 = vector.shape_cast %122 : vector<16x128xf32> to vector<1x1x16x128xf32>
    tpu.vector_store %arg3[%c0_53, %c1_54, %c0_55, %c0_56], %125 {strides = array<i32>} : memref<1x4x16x128xf32, #tpu.memory_space<vmem>>, vector<1x1x16x128xf32>,
    %c2_57 = arith.constant 2 : index
    %126 = memref.load %arg2[%c2_57] : memref<4xf32, #tpu.memory_space<smem>>
    %127 = vector.broadcast %126 : f32 to vector<16x128xf32>
    %128 = arith.addf %109, %127 : vector<16x128xf32>
    %cst_58 = arith.constant 0.000000e+00 : f32
    %129 = vector.broadcast %cst_58 : f32 to vector<16x128xf32>
    %130 = arith.maximumf %128, %129 : vector<16x128xf32>
    %c0_59 = arith.constant 0 : index
    %c2_60 = arith.constant 2 : index
    %c0_61 = arith.constant 0 : index
    %c0_62 = arith.constant 0 : index
    %131 = vector.load %arg3[%c0_59, %c2_60, %c0_61, %c0_62] : memref<1x4x16x128xf32, #tpu.memory_space<vmem>>, vector<1x1x16x128xf32>
    %132 = vector.shape_cast %131 : vector<1x1x16x128xf32> to vector<16x128xf32>
    %133 = vector.shape_cast %130 : vector<16x128xf32> to vector<1x1x16x128xf32>
    tpu.vector_store %arg3[%c0_59, %c2_60, %c0_61, %c0_62], %133 {strides = array<i32>} : memref<1x4x16x128xf32, #tpu.memory_space<vmem>>, vector<1x1x16x128xf32>,
    %c3_63 = arith.constant 3 : index
    %134 = memref.load %arg2[%c3_63] : memref<4xf32, #tpu.memory_space<smem>>
    %135 = vector.broadcast %134 : f32 to vector<16x128xf32>
    %136 = arith.addf %109, %135 : vector<16x128xf32>
    %cst_64 = arith.constant 0.000000e+00 : f32
    %137 = vector.broadcast %cst_64 : f32 to vector<16x128xf32>
    %138 = arith.maximumf %136, %137 : vector<16x128xf32>
    %c0_65 = arith.constant 0 : index
    %c3_66 = arith.constant 3 : index
    %c0_67 = arith.constant 0 : index
    %c0_68 = arith.constant 0 : index
    %139 = vector.load %arg3[%c0_65, %c3_66, %c0_67, %c0_68] : memref<1x4x16x128xf32, #tpu.memory_space<vmem>>, vector<1x1x16x128xf32>
    %140 = vector.shape_cast %139 : vector<1x1x16x128xf32> to vector<16x128xf32>
    %141 = vector.shape_cast %138 : vector<16x128xf32> to vector<1x1x16x128xf32>
    tpu.vector_store %arg3[%c0_65, %c3_66, %c0_67, %c0_68], %141 {strides = array<i32>} : memref<1x4x16x128xf32, #tpu.memory_space<vmem>>, vector<1x1x16x128xf32>,
    return
  }
  func.func @transform_0(%arg0: i32) -> (i32, i32, i32, i32) {
    %c0_i32 = arith.constant 0 : i32
    %c0_i32_0 = arith.constant 0 : i32
    %c0_i32_1 = arith.constant 0 : i32
    %c0_i32_2 = arith.constant 0 : i32
    return %arg0, %c0_i32, %c0_i32_0, %c0_i32_1 : i32, i32, i32, i32
  }
  func.func @transform_1(%arg0: i32) -> i32 {
    %c0_i32 = arith.constant 0 : i32
    %c0_i32_0 = arith.constant 0 : i32
    return %c0_i32 : i32
  }
  func.func @transform_2(%arg0: i32) -> (i32, i32, i32, i32) {
    %c0_i32 = arith.constant 0 : i32
    %c0_i32_0 = arith.constant 0 : i32
    %c0_i32_1 = arith.constant 0 : i32
    %c0_i32_2 = arith.constant 0 : i32
    return %arg0, %c0_i32, %c0_i32_0, %c0_i32_1 : i32, i32, i32, i32
  }
}

</mosaic_0001>

<bundles_post_ra>
// kernel: tpu_custom_call.1
= control target key start
LH: loop header
LB: loop body
LE: loop exit
PB: predicated region body
PF: predicated region fallthrough
CT: control target
= control target key end

     0   :  { %7 = vsyncpa [#allocation4], 0  ;;  %s975_s0 = inlined_call_operand.hbm [shape: f32[2,4,16,16], index: 0, kind: input, shape index: {}]   ;;  %s976_s1 = inlined_call_operand.vmem [shape: f32[4], index: 1, kind: input, shape index: {}]   ;;  %s977_s2 = inlined_call_operand.hbm [shape: f32[2,4,16,128], index: 2, kind: output, shape index: {}]  }
   0x1   :  { %9 = vsyncpa [#allocation4 + $0x1], 0 }
   0x2   :  { %10 = vsyncpa [#allocation6], 0 }
   0x3   :  { %11 = vsyncpa [#allocation5], 0 }
   0x4   :  { %13 = vsyncpa [#allocation5 + $0x1], 0  ;;  %s728_s9 = smov 0   ;;  %s730_s10 = smov 0  }
   0x5   :  { %s732_s11 = smov 0   ;;  %s734_s12 = smov 0  }
   0x6 LB: > { %s749_s13 = sadd.s32 4294967295, %s695_s12   ;;  %s477_s14 = sadd.s32 4294967294, %s695_s12   ;;  %s695_s12 = sphi %s734_s12, %s997_s12   ;;  %s691_s11 = sphi %s732_s11, %s996_s11   ;;  %s687_s10 = sphi %s730_s10, %s995_s10   ;;  %s683_s9 = sphi %s728_s9, %s994_s9  }
   0x7   : > { %s753_s15 = sadd.s32 1, %s695_s12   ;;  %s26_s16 = sadd.s32 1, %s691_s11 }
   0x8   : > { %s23_s17 = ssub.s32 %s695_s12, %s753_s15  ;;  %p33_p0 = scmp.ne.s32.totalorder %s691_s11, %s687_s10 }
   0x9   : > { %p24_p1 = scmp.eq.s32.totalorder %s23_s17, 0  ;;  %p34_p2 = scmp.eq.s32.totalorder %s695_s12, 0 }
   0xa   : > { %p39_p3 = scmp.ne.s32.totalorder %s687_s10, %s683_s9  ;;  %p979_p4 = scmp.eq.s32.totalorder %s749_s13, 0 }
   0xb   : > { %s765_s18 = scalar_select %p24_p1, %s691_s11, %s26_s16  }
   0xc   : > { %p767_p5 = por %p34_p2, %p33_p0  ;;  %p773_p6 = por %p979_p4, %p39_p3 }
   0xd   : > { %p84_p7 = scmp.eq.s32.totalorder %s749_s13, 1  ;;  %p90_p8 = scmp.eq.s32.totalorder %s477_s14, 1 }
   0xe   : > { %s982_s20 = scalar_select %p773_p6, 1, 0 }
   0xf   : > { %p478_p9 = scmp.ge.s32.totalorder %s695_s12, 1  ;;  %p97_p10 = scmp.lt.s32.totalorder %s695_s12, 3 }
  0x10   : > { %p780_p11 = por %p84_p7, %p33_p0  ;;  %p784_p12 = por %p90_p8, %p39_p3 }
  0x11   : > { %p788_p13 = pnand %p478_p9, %p97_p10  ;;  %s110_s26 = sshll.u32 %s976_s1, 4  ;;  %s111_s26 = int_to_ptr.vmem [resolvable:$true] %s110_s26 }
  0x12   : > { %s983_s21 = scalar_select %p780_p11, 1, 0 }
  0x13   : > { %s984_s22 = scalar_select %p784_p12, 1, 0 }
  0x14   : > { %p518_p1 = pneg %p788_p13  ;;  %p531_p2 = scmp.lt.s32.totalorder %s695_s12, 2 }
  0x15   : > { %s121_s28 = sand.u32 1, %s691_s11   ;;  %s580_s3 = scalar_lea.vmem %s111_s26, 16 }
  0x16   : > { %p801_p7 = pnand %p518_p1, %p979_p4  ;;  %p808_p3 = pnand %p531_p2, %p767_p5 }
  0x17   : > { %s481_s30 = sshll.u32 %s121_s28, 6  ;;  %p581_p8 = scmp.ne.s32.totalorder %s111_s26, %s580_s3 }
  0x18   : > { %p582_p9 = pneg %p801_p7  ;;  %p588_p12 = scmp.lt.s32.totalorder %s111_s26, %s111_s26 }
  0x19   : > { %p589_p11 = scmp.lt.s32.totalorder %s580_s3, %s580_s3 }
  0x1a   : > { %p583_p10 = pnand %p582_p9, %p581_p8 }
  0x1b   : > { %p590_p1 = por %p589_p11, %p588_p12 }
  0x1c   : > { %p584_p0 = pneg %p583_p10 }
  0x1e   : > { %p591_p4 = pnand %p590_p1, %p584_p0 }
  0x20   : > { %594 = shalt.err (!%p591_p4)
}
  0x21   : > { %s697_s4 = smov [#allocation7]   ;;  %s508_s5 = sshll.u32 %s695_s12, 10 }
  0x22   : > { %521 = dma.vmem_to_smem (!%p801_p7), %s111_s26, 16, %s697_s4, [#allocation6]  }
  0x23   : > { %s125_s6 = scalar_lea.vmem [#allocation3], %s481_s30  ;;  %s820_s16 = scalar_lea.hbm %s975_s0, %s508_s5 }
  0x24   : > { %s132_s7 = sshll.u32 %s125_s6, 4  ;;  %s824_s17 = scalar_lea.sflag [#allocation4], %s121_s28  ;;  %s822_s7 = int_to_ptr.vmem [resolvable:$true] %s132_s7 }
  0x25   : > { %s595_s19 = scalar_lea.hbm %s820_s16, 1024  ;;  %p597_p5 = pneg %p808_p3 }
  0x26   : > { %p596_p4 = scmp.ne.s32.totalorder %s820_s16, %s595_s19  ;;  %s600_s26 = scalar_lea.hbm %s975_s0, 2048 }
  0x27   : > { %p601_p0 = scmp.lt.u32.totalorder %s820_s16, %s975_s0  ;;  %p602_p2 = scmp.lt.u32.totalorder %s600_s26, %s595_s19 }
  0x28   : > { %p598_p11 = pnand %p597_p5, %p596_p4  ;;  %p604_p8 = scmp.lt.u32.totalorder %s595_s19, %s820_s16 }
  0x29   : > { %p603_p7 = por %p602_p2, %p601_p0 }
  0x2a   : > { %p599_p12 = pneg %p598_p11 }
  0x2b   : > { %p605_p9 = por %p604_p8, %p603_p7 }
  0x2d   : > { %p606_p10 = pnand %p605_p9, %p599_p12 }
  0x2f   : > { %609 = shalt.err (!%p606_p10)
}
  0x30   : > { %s610_s28 = scalar_lea.vmem %s822_s7, 1024  ;;  %s698_s3 = smov [#allocation3]  }
  0x31   : > { %p611_p1 = scmp.ne.s32.totalorder %s822_s7, %s610_s28  ;;  %s615_s4 = sshll.u32 %s698_s3, 4  ;;  %s616_s4 = int_to_ptr.vmem [resolvable:$false] %s615_s4 }
  0x32   : > { %s617_s5 = scalar_lea.vmem %s616_s4, 2048  ;;  %p618_p6 = scmp.lt.s32.totalorder %s822_s7, %s616_s4 }
  0x33   : > { %p613_p4 = pnand %p611_p1, %p597_p5  ;;  %p619_p0 = scmp.lt.s32.totalorder %s617_s5, %s610_s28 }
  0x35   : > { %p614_p11 = pneg %p613_p4  ;;  %p620_p2 = por %p619_p0, %p618_p6 }
  0x37   : > { %p621_p7 = pnand %p620_p2, %p614_p11 }
  0x39   : > { %624 = shalt.err (!%p621_p7)
}
  0x3a   : > { %s699_s6 = smov 128   ;;  %s700_s8 = smov 8  }
  0x3b   : > { %525 = dma.hbm_to_vmem [thread:$0]  (!%p808_p3), %s820_s16, 1024, %s822_s7, %s824_s17, %s699_s6, %s699_s6, %s700_s8  }
  0x3c   : > { %144 = sbr.rel (%p788_p13) target bundleno = 271 (0x10f), region = 28  ;;  %s855_s14 = sand.u32 (!%p788_p13), 1, %s687_s10  }
  0x3d   : > { %s485_s19 = sshll.u32 (!%p788_p13), %s855_s14, 6  ;;  %s147_s24 = scalar_lea.sflag (!%p788_p13), [#allocation4], %s855_s14 }
  0x3e   : > { %s150_s25 = scalar_lea.vmem (!%p788_p13), [#allocation3], %s485_s19  ;;  %p988_p6 = scmp.ne.s32.totalorder (!%p788_p13), %s982_s20, 0 }
  0x43   : > { %670 = dma.done.wait (%p988_p6), %s147_s24, 1024  }
  0x44   : > { %672 = vsyncadd (%p988_p6), %s147_s24, 4294966272  ;;  %p989_p3 = scmp.eq.s32.totalorder %s749_s13, 0 }
  0x46   : > { %674 = dma.done.wait (%p989_p3), [#allocation6], 16   ;;  %p990_p13 = pmov %p989_p3 }
  0x48   : > { %676 = vsyncadd (%p990_p13), [#allocation6], 4294967280 }
  0x49   : > { %159 = sfence }
  0x4a   : > { %v176_v0 = vld [vmem:[%s150_s25] sm:$0xff]  ;;  %v177_v1 = vld [vmem:[%s150_s25 + $0x8] sm:$0xff]  ;;  %v488_v2 = vld [vmem:[%s150_s25 + $0x10] sm:$0xff]  ;;  %v701_v7 = vmov 0.0   ;;  %vm197_vm0 = vcmask 130048   ;;  %s702_s20 = smov 4  }
  0x4b   : > { %v489_v3 = vld [vmem:[%s150_s25 + $0x18] sm:$0xff]  ;;  %v490_v4 = vld [vmem:[%s150_s25 + $0x20] sm:$0xff]  ;;  %v491_v5 = vld [vmem:[%s150_s25 + $0x28] sm:$0xff]  ;;  %v187_v6 = vadd.f32 %v488_v2, %v176_v0  ;;  %193 = vst [vmem:[#allocation2] sm:$0xff] %v701_v7  ;;  %s703_s23 = smov 3   ;;  %s704_s29 = smov 1  }
  0x4c   : > { %194 = vst [vmem:[#allocation2 + $0x8] sm:$0xff] %v701_v7  ;;  %195 = vst [vmem:[#allocation2 + $0x10] sm:$0xff] %v701_v7  ;;  %v492_v8 = vld [vmem:[%s150_s25 + $0x30] sm:$0xff]  ;;  %v493_v9 = vld [vmem:[%s150_s25 + $0x38] sm:$0xff]  ;;  %v188_v10 = vadd.f32 %v489_v3, %v177_v1  ;;  %s705_s7 = smov 127   ;;  %s706_s16 = smov 2  }
  0x4d   : > { %196 = vst [vmem:[#allocation2 + $0x18] sm:$0xff] %v701_v7  ;;  %v189_v11 = vadd.f32 %v492_v8, %v490_v4  ;;  %v190_v12 = vadd.f32 %v493_v9, %v491_v5  ;;  %s707_s17 = smov 126   ;;  %s708_s26 = smov 125  }
  0x4e   : > { %s709_s27 = smov 124   ;;  %s911_s30 = sld [smem:[#allocation7]] }
  0x4f   : > { %v191_v13 = vadd.f32 %v189_v11, %v187_v6  ;;  %v192_v14 = vadd.f32 %v190_v12, %v188_v10  ;;  %s913_s28 = sld [smem:[#allocation7 + $0x1]]  ;;  %s915_s3 = sld [smem:[#allocation7 + $0x2]] }
  0x50   : > { %s917_s4 = sld [smem:[#allocation7 + $0x3]]  ;;  %s509_s5 = sshll.u32 %s749_s13, 10 }
  0x51   : > { %198 = vst.msk [vmem:[#allocation2 + $0x8] sm:$0xff] %vm197_vm0, %v191_v13  ;;  %199 = vst.msk [vmem:[#allocation2 + $0x10] sm:$0xff] %vm197_vm0, %v192_v14  ;;  %s175_s6 = scalar_lea.vmem [#allocation8], %s485_s19  ;;  %s929_s13 = scalar_lea.hbm %s977_s2, %s509_s5 }
  0x52   : > { %s392_s8 = sshll.u32 %s175_s6, 4  ;;  %s379_s19 = scalar_lea.sflag [#allocation5], %s855_s14  ;;  %s931_s8 = int_to_ptr.vmem [resolvable:$true] %s392_s8 }
  0x53   : > { %p991_p12 = scmp.ne.s32.totalorder %s983_s21, 0 }
  0x58   : > { %v204_v15 = vld [vmem:[#allocation2 + $0x6] sm:$0xff]  ;;  %v205_v26 = vld [vmem:[#allocation2 + $0xe] sm:$0xff] }
  0x59   : > { %v206_v16 = vld [vmem:[#allocation2 + $0x7] sm:$0xff]  ;;  %v207_v27 = vld [vmem:[#allocation2 + $0xf] sm:$0xff] }
  0x5a   : > { %v869_v17 = vld [vmem:[#allocation2 + $0x8] sm:$0xff]  ;;  %v879_v29 = vld [vmem:[#allocation2 + $0x10] sm:$0xff] }
  0x5b   : > { %v210_v18 = vld [vmem:[#allocation2 + $0x9] sm:$0xff]  ;;  %v225_v20 = vmul.f32 0.00079618, %v869_v17  ;;  %v239_v25 = vmul.f32 0.01417197, %v869_v17  ;;  %v211_v30 = vld [vmem:[#allocation2 + $0x11] sm:$0xff] }
  0x5c   : > { %v212_v19 = vld [vmem:[#allocation2 + $0xa] sm:$0xff]  ;;  %v874_v23 = vadd.f32 %v210_v18, %v206_v16  ;;  %v213_v31 = vld [vmem:[#allocation2 + $0x12] sm:$0xff]  ;;  %v882_v32 = vmul.f32 0.06464968, %v869_v17  ;;  %v222_v39 = vadd.f32 %v211_v30, %v207_v27  ;;  %v226_v40 = vmul.f32 0.00079618, %v879_v29 }
  0x5d   : > { %v202_v21 = vld [vmem:[#allocation2 + $0x5] sm:$0xff]  ;;  %v872_v22 = vadd.f32 %v212_v19, %v204_v15  ;;  %v218_v36 = vadd.f32 %v213_v31, %v205_v26  ;;  %v203_v43 = vld [vmem:[#allocation2 + $0xd] sm:$0xff]  ;;  %v240_v54 = vmul.f32 0.01417197, %v879_v29  ;;  %v258_v19 = vmul.f32 0.06464968, %v879_v29 }
  0x5e   : > { %v214_v24 = vld [vmem:[#allocation2 + $0xb] sm:$0xff]  ;;  %v223_v34 = vmul.f32 0.00047771, %v874_v23  ;;  %v237_v38 = vmul.f32 0.00971338, %v874_v23  ;;  %v215_v44 = vld [vmem:[#allocation2 + $0x13] sm:$0xff] }
  0x5f   : > { %v877_v28 = vadd.f32 %v214_v24, %v202_v21  ;;  %v219_v33 = vmul.f32 0.00015924, %v872_v22  ;;  %v235_v35 = vmul.f32 0.00286624, %v872_v22  ;;  %v220_v42 = vmul.f32 0.00015924, %v218_v36 }
  0x60   : > { %v236_v45 = vmul.f32 0.00286624, %v218_v36  ;;  %v243_v47 = vadd.f32 %v239_v25, %v237_v38  ;;  %v224_v48 = vmul.f32 0.00047771, %v222_v39  ;;  %v232_v49 = vadd.f32 %v215_v44, %v203_v43  ;;  %v201_v50 = vld [vmem:[#allocation2 + $0xc] sm:$0xff]  ;;  %v216_v51 = vld [vmem:[#allocation2 + $0x14] sm:$0xff] }
  0x61   : > { %v233_v37 = vmul.f32 0.00031847, %v877_v28  ;;  %v227_v41 = vadd.f32 %v223_v34, %v219_v33  ;;  %v238_v53 = vmul.f32 0.00971338, %v222_v39  ;;  %v248_v55 = vadd.f32 %v216_v51, %v201_v50  ;;  %v200_v56 = vld [vmem:[#allocation2 + $0x4] sm:$0xff] }
  0x62   : > { %v228_v58 = vadd.f32 %v224_v48, %v220_v42  ;;  %v234_v59 = vmul.f32 0.00031847, %v232_v49  ;;  %v270_v60 = vmul.f32 0.00971338, %v232_v49  ;;  %v272_v63 = vmul.f32 0.0522293, %v218_v36 }
  0x63   : > { %v241_v46 = vadd.f32 %v235_v35, %v233_v37  ;;  %v890_v52 = vadd.f32 %v227_v41, %v225_v20  ;;  %v244_v61 = vadd.f32 %v240_v54, %v238_v53  ;;  %v268_v62 = vmul.f32 0.00047771, %v248_v55 }
  0x64   : > { %v274_v0 = vmul.f32 0.05859873, %v222_v39  ;;  %v230_v1 = vadd.f32 %v228_v58, %v226_v40  ;;  %v242_v2 = vadd.f32 %v236_v45, %v234_v59  ;;  %v247_v3 = vadd.f32 %v201_v50, %v200_v56 }
  0x65   : > { %v893_v57 = vadd.f32 %v243_v47, %v241_v46  ;;  %295 = vrot.lane.b32.xlu0 %v890_v52, %s702_s20  ;;  %v269_v4 = vmul.f32 0.00971338, %v877_v28  ;;  %v276_v5 = vadd.f32 %v270_v60, %v268_v62  ;;  %v271_v7 = vmul.f32 0.0522293, %v872_v22 }
  0x66   : > { %v278_v6 = vadd.f32 %v274_v0, %v272_v63  ;;  %v273_v8 = vmul.f32 0.05859873, %v874_v23  ;;  %v246_v9 = vadd.f32 %v244_v61, %v242_v2  ;;  %v267_v10 = vmul.f32 0.00047771, %v247_v3 }
  0x67   : > { %299 = vrot.lane.b32.xlu1 %v893_v57, %s703_s23  ;;  %v250_v11 = vmul.f32 0.00015924, %v248_v55  ;;  %v252_v12 = vmul.f32 0.00286624, %v232_v49  ;;  %v254_v15 = vmul.f32 0.02038217, %v218_v36 }
  0x68   : > { %v280_v13 = vadd.f32 %v278_v6, %v276_v5  ;;  %v277_v14 = vadd.f32 %v273_v8, %v271_v7  ;;  %v256_v16 = vmul.f32 0.0522293, %v222_v39  ;;  %v275_v18 = vadd.f32 %v269_v4, %v267_v10 }
  0x69   : > { %297 = vrot.lane.b32.xlu0 %v230_v1, %s702_s20  ;;  %v260_v20 = vadd.f32 %v252_v12, %v250_v11  ;;  %v249_v21 = vmul.f32 0.00015924, %v247_v3  ;;  %v251_v25 = vmul.f32 0.00286624, %v877_v28  ;;  %v253_v26 = vmul.f32 0.02038217, %v872_v22 }
  0x6a   : > { %v262_v24 = vadd.f32 %v256_v16, %v254_v15  ;;  %v255_v27 = vmul.f32 0.0522293, %v874_v23  ;;  %v279_v30 = vadd.f32 %v277_v14, %v275_v18  ;;  %v282_v31 = vmul.f32 0.00079618, %v248_v55  ;;  %s625_s20 = scalar_lea.vmem %s931_s8, 1024 }
  0x6b   : > { %301 = vrot.lane.b32.xlu1 %v246_v9, %s703_s23  ;;  %v284_v33 = vmul.f32 0.01417197, %v232_v49  ;;  %v286_v34 = vmul.f32 0.06464968, %v218_v36  ;;  %v259_v37 = vadd.f32 %v251_v25, %v249_v21  ;;  %v288_v39 = vmul.f32 -0.15923567, %v879_v29  ;;  %p626_p5 = scmp.ne.s32.totalorder %s931_s8, %s625_s20 }
  0x6c   : > { %v264_v35 = vadd.f32 %v262_v24, %v260_v20  ;;  %v261_v38 = vadd.f32 %v255_v27, %v253_v26  ;;  %v281_v41 = vmul.f32 0.00079618, %v247_v3  ;;  %v283_v42 = vmul.f32 0.01417197, %v877_v28  ;;  %s710_s23 = smov [#allocation8]  }
  0x6d   : > { %307 = vrot.lane.b32.xlu0 %v279_v30, %s704_s29  ;;  %v290_v40 = vadd.f32 %v284_v33, %v282_v31  ;;  %v285_v43 = vmul.f32 0.06464968, %v872_v22  ;;  %v292_v23 = vadd.f32 %v288_v39, %v286_v34  ;;  %v287_v45 = vmul.f32 -0.15923567, %v869_v17  ;;  %p627_p8 = pnand %p626_p5, %p991_p12 }
  0x6e   : > { %v263_v44 = vadd.f32 %v261_v38, %v259_v37  ;;  %v289_v46 = vadd.f32 %v283_v42, %v281_v41  ;;  %v266_v29 = vadd.f32 %v264_v35, %v258_v19  ;;  %v344_v12 = vstv %s911_s30 }
  0x6f   : > { %309 = vrot.lane.b32.xlu1 %v280_v13, %s704_s29  ;;  %v294_v36 = vadd.f32 %v292_v23, %v290_v40  ;;  %v291_v47 = vadd.f32 %v287_v45, %v285_v43  ;;  %v361_v14 = vstv %s915_s3  ;;  %v370_v15 = vstv %s917_s4  ;;  %p628_p9 = pneg %p627_p8  ;;  %s629_s29 = sshll.u32 %s710_s23, 4  ;;  %s630_s29 = int_to_ptr.vmem [resolvable:$false] %s629_s29 }
  0x70   : > { %v265_v48 = vadd.f32 %v263_v44, %v882_v32  ;;  %p632_p10 = scmp.lt.s32.totalorder %s931_s8, %s630_s29 }
  0x71   : > { %311 = vrot.lane.b32.xlu0 %v279_v30, %s705_s7  ;;  %v293_v49 = vadd.f32 %v291_v47, %v289_v46 }
  0x73   : > { %313 = vrot.lane.b32.xlu1 %v280_v13, %s705_s7  ;;  %v352_v13 = vstv %s913_s28  ;;  %s631_s7 = scalar_lea.vmem %s630_s29, 2048 }
  0x74   : > { %p633_p1 = scmp.lt.s32.totalorder %s631_s7, %s625_s20 }
  0x75   : > { %303 = vrot.lane.b32.xlu0 %v265_v48, %s706_s16 }
  0x76   : > { %p634_p4 = por %p633_p1, %p632_p10 }
  0x77   : > { %305 = vrot.lane.b32.xlu1 %v266_v29, %s706_s16 }
  0x78   : > { %p635_p11 = pnand %p634_p4, %p628_p9 }
  0x79   : > { %315 = vrot.lane.b32.xlu0 %v265_v48, %s707_s17 }
  0x7b   : > { %317 = vrot.lane.b32.xlu1 %v266_v29, %s707_s17 }
  0x7d   : > { %319 = vrot.lane.b32.xlu0 %v893_v57, %s708_s26 }
  0x7f   : > { %321 = vrot.lane.b32.xlu1 %v246_v9, %s708_s26 }
  0x81   : > { %323 = vrot.lane.b32.xlu0 %v890_v52, %s709_s27 }
  0x83   : > { %325 = vrot.lane.b32.xlu1 %v230_v1, %s709_s27 }
  0xd7   : > { %v296_v17 = vpop.permute.xlu0 %295 }
  0xd9   : > { %v300_v22 = vpop.permute.xlu1 %299 }
  0xda   : > { %v327_v60 = vadd.f32 %v300_v22, %v296_v17 }
  0xdb   : > { %v298_v28 = vpop.permute.xlu0 %297 }
  0xdd   : > { %v302_v50 = vpop.permute.xlu1 %301 }
  0xde   : > { %v328_v61 = vadd.f32 %v302_v50, %v298_v28 }
  0xdf   : > { %v308_v51 = vpop.permute.xlu0 %307 }
  0xe1   : > { %v310_v32 = vpop.permute.xlu1 %309 }
  0xe3   : > { %v312_v54 = vpop.permute.xlu0 %311 }
  0xe4   : > { %v331_v1 = vadd.f32 %v312_v54, %v293_v49 }
  0xe5   : > { %v314_v53 = vpop.permute.xlu1 %313 }
  0xe6   : > { %v332_v0 = vadd.f32 %v314_v53, %v294_v36 }
  0xe7   : > { %v304_v56 = vpop.permute.xlu0 %303 }
  0xe8   : > { %v329_v57 = vadd.f32 %v308_v51, %v304_v56 }
  0xe9   : > { %v306_v55 = vpop.permute.xlu1 %305 }
  0xea   : > { %v330_v52 = vadd.f32 %v310_v32, %v306_v55  ;;  %v335_v5 = vadd.f32 %v329_v57, %v327_v60 }
  0xeb   : > { %v316_v59 = vpop.permute.xlu0 %315 }
  0xec   : > { %v336_v4 = vadd.f32 %v330_v52, %v328_v61 }
  0xed   : > { %v318_v58 = vpop.permute.xlu1 %317 }
  0xef   : > { %v320_v63 = vpop.permute.xlu0 %319 }
  0xf0   : > { %v333_v3 = vadd.f32 %v320_v63, %v316_v59 }
  0xf1   : > { %v322_v62 = vpop.permute.xlu1 %321 }
  0xf2   : > { %v334_v2 = vadd.f32 %v322_v62, %v318_v58  ;;  %v337_v7 = vadd.f32 %v333_v3, %v331_v1 }
  0xf3   : > { %v324_v9 = vpop.permute.xlu0 %323 }
  0xf4   : > { %v338_v6 = vadd.f32 %v334_v2, %v332_v0  ;;  %v339_v11 = vadd.f32 %v337_v7, %v335_v5 }
  0xf5   : > { %v326_v8 = vpop.permute.xlu1 %325 }
  0xf6   : > { %v340_v10 = vadd.f32 %v338_v6, %v336_v4  ;;  %v341_v18 = vadd.f32 %v339_v11, %v324_v9 }
  0xf8   : > { %v342_v16 = vadd.f32 %v340_v10, %v326_v8  ;;  %v345_v25 = vadd.f32 %v344_v12, %v341_v18  ;;  %v353_v26 = vadd.f32 %v352_v13, %v341_v18  ;;  %v362_v27 = vadd.f32 %v361_v14, %v341_v18 }
  0xf9   : > { %v371_v30 = vadd.f32 %v370_v15, %v341_v18 }
  0xfa   : > { %v346_v19 = vadd.f32 %v344_v12, %v342_v16  ;;  %v354_v20 = vadd.f32 %v352_v13, %v342_v16  ;;  %v363_v21 = vadd.f32 %v361_v14, %v342_v16  ;;  %v372_v24 = vadd.f32 %v370_v15, %v342_v16 }
  0xfb   : > { %v347_v37 = vmax.f32 %v345_v25, 0.0  ;;  %v355_v38 = vmax.f32 %v353_v26, 0.0  ;;  %v364_v39 = vmax.f32 %v362_v27, 0.0  ;;  %v373_v40 = vmax.f32 %v371_v30, 0.0 }
  0xfc   : > { %v348_v31 = vmax.f32 %v346_v19, 0.0  ;;  %v356_v33 = vmax.f32 %v354_v20, 0.0  ;;  %v365_v34 = vmax.f32 %v363_v21, 0.0  ;;  %v374_v35 = vmax.f32 %v372_v24, 0.0 }
  0xfd   : > { %349 = vst [vmem:[%s175_s6] sm:$0xff] %v347_v37  ;;  %495 = vst [vmem:[%s175_s6 + $0x10] sm:$0xff] %v355_v38 }
  0xfe   : > { %350 = vst [vmem:[%s175_s6 + $0x8] sm:$0xff] %v348_v31  ;;  %496 = vst [vmem:[%s175_s6 + $0x18] sm:$0xff] %v356_v33 }
  0xff   : > { %499 = vst [vmem:[%s175_s6 + $0x28] sm:$0xff] %v365_v34  ;;  %502 = vst [vmem:[%s175_s6 + $0x38] sm:$0xff] %v374_v35 }
 0x100   : > { %498 = vst [vmem:[%s175_s6 + $0x20] sm:$0xff] %v364_v39  ;;  %501 = vst [vmem:[%s175_s6 + $0x30] sm:$0xff] %v373_v40 }
 0x101   : > { %638 = shalt.err (!%p635_p11)
}
 0x102   : > { %s639_s16 = scalar_lea.hbm %s929_s13, 1024  ;;  %s643_s27 = scalar_lea.hbm %s977_s2, 2048 }
 0x103   : > { %p640_p0 = scmp.ne.s32.totalorder %s929_s13, %s639_s16  ;;  %p644_p6 = scmp.lt.u32.totalorder %s929_s13, %s977_s2 }
 0x104   : > { %p645_p3 = scmp.lt.u32.totalorder %s643_s27, %s639_s16  ;;  %p647_p5 = scmp.lt.u32.totalorder %s639_s16, %s929_s13 }
 0x105   : > { %p641_p2 = pnand %p640_p0, %p991_p12 }
 0x106   : > { %p646_p13 = por %p645_p3, %p644_p6 }
 0x107   : > { %p642_p7 = pneg %p641_p2 }
 0x108   : > { %p648_p8 = por %p647_p5, %p646_p13 }
 0x10a   : > { %p649_p9 = pnand %p648_p8, %p642_p7 }
 0x10c   : > { %652 = shalt.err (!%p649_p9)
}
 0x10d   : > { %s711_s3 = smov 128   ;;  %s712_s4 = smov 8  }
 0x10e   : > { %516 = dma.vmem_to_hbm [thread:$0]  (%p991_p12), %s931_s8, 1024, %s929_s13, %s379_s19, %s711_s3, %s711_s3, %s712_s4  }
 0x10f PF: > { %s407_s5 = sand.u32 1, %s683_s9   ;;  %p992_p10 = scmp.ne.s32.totalorder %s984_s22, 0 }
 0x110   : > { %p993_p1 = scmp.ge.s32.totalorder %s695_s12, 2  ;;  %s408_s6 = scalar_lea.sflag [#allocation5], %s407_s5 }
 0x112   : > { %p527_p4 = pnand %p993_p1, %p992_p10 }
 0x114   : > { %678 = dma.done.wait (!%p527_p4), %s408_s6, 1024  }
 0x115   : > { %680 = vsyncadd (!%p527_p4), %s408_s6, 4294966272  ;;  %p16_p11 = scmp.ge.s32.totalorder %s753_s15, 4   ;;  %s994_s9 = smov %s687_s10 }
 0x116   : > { %s995_s10 = smov %s691_s11  ;;  %s996_s11 = smov %s765_s18 }
 0x117   : > { %s997_s12 = smov %s753_s15  ;;  %18 = sbr.rel (!%p16_p11) target bundleno = 6 (0x6), region = 84 }
 0x11e   :  { %413 = vsyncpa [#allocation4], 1 }
 0x11f   :  { %415 = vsyncpa [#allocation4 + $0x1], 1 }
 0x120   :  { %416 = vsyncpa [#allocation5], 1 }
 0x121   :  { %418 = vsyncpa [#allocation5 + $0x1], 1 }
 0x122   :  { %419 = vsyncpa [#allocation6], 1 }
 0x123   :  { %421 = vsyncpa [#allocation6 + $0x1], 1 }

</bundles_post_ra>
